<compile_context>
chip_gen: v7x
topology: tpu7x:2x2x1
jax: 0.10.0
libtpu: 0.0.40
codegen_flags: <defaults>
</compile_context>

<pallas_src>
import functools

import numpy as np
import jax
import jax.numpy as jnp
from jax import lax
from jax.experimental import pallas as pl
from jax.experimental.pallas import tpu as pltpu

# MXU operand dtype. bf16 avoids f32 multi-pass MXU emulation (2-3x faster) and
# halves weight / QKV-projection HBM traffic; accumulation stays f32.
MATMUL_DTYPE = jnp.bfloat16


# -----------------------------------------------------------------------------
# Chip-aware tiling / VMEM budgeting helpers
# -----------------------------------------------------------------------------

def _vmem_capacity_bytes():
    try:
        return int(pltpu.get_tpu_info().vmem_capacity_bytes)
    except Exception:
        return 64 * 1024 * 1024  # conservative (v7x-sized) fallback


_VMEM_CAP = _vmem_capacity_bytes()
_BIG_VMEM = _VMEM_CAP >= (100 << 20)          # v5e / v6e (128 MiB) vs v7x (64 MiB)
_LINEAR_TILE = 512 if _BIG_VMEM else 256      # row tile for the GEMV-like linears
_ATTN_TQ = 256 if _BIG_VMEM else 128          # query-row tile for attention


def _nbytes(shape, dtype):
    return int(np.prod(shape)) * int(np.dtype(dtype).itemsize)


def _vmem_limit(pipelined_bytes, resident_bytes=0):
    """Explicit scoped-VMEM limit: pipelined blocks are double-buffered."""
    need = 2 * pipelined_bytes + resident_bytes + (2 << 20)
    cap = max(_VMEM_CAP - (4 << 20), 16 << 20)
    return int(min(max(need, 8 << 20), cap))


def _row_tile(m, target):
    """Row tile <= target; prefer an exact divisor (multiple of 8)."""
    if m <= target:
        return m
    for t in range(target, 7, -8):
        if m % t == 0:
            return t
    return target  # ragged last block handled by pl.cdiv grid + masked writeback


def _col_tile(n, target):
    """KV tile that must divide n exactly (softmax over garbage cols otherwise)."""
    if n <= target:
        return n
    for t in range(target, 7, -8):
        if n % t == 0:
            return t
    return n  # TODO(synk): masked ragged KV tile for awkward len_k


# -----------------------------------------------------------------------------
# Pallas kernels
# -----------------------------------------------------------------------------

def _linear_kernel(x_ref, w_ref, b_ref, o_ref):
    x = x_ref[...].astype(MATMUL_DTYPE)
    w = w_ref[...].astype(MATMUL_DTYPE)
    acc = jnp.dot(x, w, preferred_element_type=jnp.float32) + b_ref[...]
    o_ref[...] = acc.astype(o_ref.dtype)


def _fused_qkv_kernel(x_ref, w_ref, b_ref, oq_ref, ok_ref, ov_ref, *, nq, nk):
    # Single pass over x: x @ [wq|wk|wv] + [bq|bk|bv], then split lanes.
    x = x_ref[...].astype(MATMUL_DTYPE)
    w = w_ref[...].astype(MATMUL_DTYPE)
    res = jnp.dot(x, w, preferred_element_type=jnp.float32) + b_ref[...]
    oq_ref[...] = res[:, :nq].astype(oq_ref.dtype)
    ok_ref[...] = res[:, nq:nq + nk].astype(ok_ref.dtype)
    ov_ref[...] = res[:, nq + nk:].astype(ov_ref.dtype)


def _linear_residual_kernel(x_ref, w_ref, b_ref, r_ref, o_ref):
    x = x_ref[...].astype(MATMUL_DTYPE)
    w = w_ref[...].astype(MATMUL_DTYPE)
    acc = jnp.dot(x, w, preferred_element_type=jnp.float32)
    o_ref[...] = (acc + b_ref[...] + r_ref[...].astype(jnp.float32)
                  ).astype(o_ref.dtype)


def _mha_attn_full_kernel(q_ref, k_ref, v_ref, o_ref, attn_ref, *,
                          n_head, d_k, d_v, inv_temp):
    # Full-Lk softmax (attention probabilities are returned).
    # q_ref: (1, tq, n_head*d_k)   k_ref: (1, Lk, n_head*d_k)
    # v_ref: (1, Lk, n_head*d_v)   o_ref: (1, tq, n_head*d_v)
    # attn_ref: (n_head, 1, tq, Lk)
    q2 = q_ref[0]
    k2 = k_ref[0]
    v2 = v_ref[0]
    # TODO(synk): mask=None path only; boolean masked_fill(-inf) not wired in.
    # TODO(synk): fully batched head dot_general (one in-kernel reshape) would
    # remove the per-head lane slices below; kept per-head to stay on the
    # proven lowering path, but each P@V result is stored straight into its
    # lane slice of o_ref (no jnp.concatenate / per-head live outputs).
    for h in range(n_head):  # static unroll; heads sliced from lanes in VMEM
        qh = (q2[:, h * d_k:(h + 1) * d_k].astype(jnp.float32)
              * inv_temp).astype(MATMUL_DTYPE)
        kh = k2[:, h * d_k:(h + 1) * d_k].astype(MATMUL_DTYPE)
        vh = v2[:, h * d_v:(h + 1) * d_v].astype(MATMUL_DTYPE)
        # contract last dims of both operands -> no explicit k.T relayout
        s = lax.dot_general(qh, kh, (((1,), (1,)), ((), ())),
                            preferred_element_type=jnp.float32)
        m = jnp.max(s, axis=-1, keepdims=True)
        e = jnp.exp(s - m)            # TODO(synk): bf16 exp on v6e/v7x (EUP x2)
        denom = jnp.sum(e, axis=-1, keepdims=True)
        p = e * pl.reciprocal(denom, approx=True)
        attn_ref[h, 0, :, :] = p.astype(attn_ref.dtype)
        o_ref[0, :, h * d_v:(h + 1) * d_v] = jnp.dot(
            p.astype(MATMUL_DTYPE), vh,
            preferred_element_type=jnp.float32).astype(o_ref.dtype)


def _mha_attn_flash_kernel(q_ref, k_ref, v_ref, o_ref, m_sc, l_sc, acc_sc, *,
                           n_head, d_k, d_v, inv_temp):
    # Online-softmax (flash) path used when attention probs are NOT returned.
    # Grid axis 2 walks Lk tiles; accumulators live in VMEM scratch.
    ki = pl.program_id(2)

    @pl.when(ki == 0)
    def _():
        m_sc[...] = jnp.full_like(m_sc, -jnp.inf)
        l_sc[...] = jnp.zeros_like(l_sc)
        acc_sc[...] = jnp.zeros_like(acc_sc)

    q2 = q_ref[0]
    k2 = k_ref[0]
    v2 = v_ref[0]
    for h in range(n_head):  # static unroll over heads
        qh = (q2[:, h * d_k:(h + 1) * d_k].astype(jnp.float32)
              * inv_temp).astype(MATMUL_DTYPE)
        kh = k2[:, h * d_k:(h + 1) * d_k].astype(MATMUL_DTYPE)
        vh = v2[:, h * d_v:(h + 1) * d_v].astype(MATMUL_DTYPE)
        s = lax.dot_general(qh, kh, (((1,), (1,)), ((), ())),
                            preferred_element_type=jnp.float32)
        m_prev = m_sc[h]                                      # (tq, 1)
        m_new = jnp.maximum(m_prev, jnp.max(s, axis=-1, keepdims=True))
        alpha = jnp.exp(m_prev - m_new)
        e = jnp.exp(s - m_new)
        l_sc[h] = alpha * l_sc[h] + jnp.sum(e, axis=-1, keepdims=True)
        acc_sc[:, h * d_v:(h + 1) * d_v] = (
            alpha * acc_sc[:, h * d_v:(h + 1) * d_v]
            + jnp.dot(e.astype(MATMUL_DTYPE), vh,
                      preferred_element_type=jnp.float32))
        m_sc[h] = m_new

    @pl.when(ki == pl.num_programs(2) - 1)
    def _():
        for h in range(n_head):
            inv = pl.reciprocal(l_sc[h], approx=True)
            o_ref[0, :, h * d_v:(h + 1) * d_v] = (
                acc_sc[:, h * d_v:(h + 1) * d_v] * inv).astype(o_ref.dtype)


# -----------------------------------------------------------------------------
# Pallas wrappers (tiled, pipelined, parallel grid axes)
# -----------------------------------------------------------------------------

def pallas_linear(x, w, b):
    M, In = x.shape
    Out = w.shape[1]
    tm = _row_tile(M, _LINEAR_TILE)
    pipelined = (_nbytes((tm, In), x.dtype) + _nbytes((In, Out), w.dtype)
                 + _nbytes((1, Out), b.dtype) + _nbytes((tm, Out), MATMUL_DTYPE))
    return pl.pallas_call(
        _linear_kernel,
        grid=(pl.cdiv(M, tm),),
        in_specs=[
            pl.BlockSpec((tm, In), lambda i: (i, 0)),
            # TODO(synk): pipeline_mode=pl.Buffered(1) on the constant-index
            # weight/bias blocks would halve their VMEM footprint on v7x.
            pl.BlockSpec((In, Out), lambda i: (0, 0)),
            pl.BlockSpec((1, Out), lambda i: (0, 0)),
        ],
        out_specs=pl.BlockSpec((tm, Out), lambda i: (i, 0)),
        out_shape=jax.ShapeDtypeStruct((M, Out), MATMUL_DTYPE),
        compiler_params=pltpu.CompilerParams(
            dimension_semantics=("parallel",),
            vmem_limit_bytes=_vmem_limit(pipelined)),
    )(x, w, b)


def pallas_fused_qkv(x, w_cat, b_cat, nq, nk):
    """One matmul for all three projections (self-attention): reads x once.
    w_cat/b_cat are pre-concatenated ONCE outside the jitted forward."""
    M, In = x.shape
    total = w_cat.shape[1]
    nv = total - nq - nk
    tm = _row_tile(M, _LINEAR_TILE)
    kernel = functools.partial(_fused_qkv_kernel, nq=nq, nk=nk)
    pipelined = (_nbytes((tm, In), x.dtype) + _nbytes((In, total), w_cat.dtype)
                 + _nbytes((1, total), b_cat.dtype)
                 + _nbytes((tm, total), MATMUL_DTYPE))
    return pl.pallas_call(
        kernel,
        grid=(pl.cdiv(M, tm),),
        in_specs=[
            pl.BlockSpec((tm, In), lambda i: (i, 0)),
            pl.BlockSpec((In, total), lambda i: (0, 0)),
            pl.BlockSpec((1, total), lambda i: (0, 0)),
        ],
        out_specs=[
            pl.BlockSpec((tm, nq), lambda i: (i, 0)),
            pl.BlockSpec((tm, nk), lambda i: (i, 0)),
            pl.BlockSpec((tm, nv), lambda i: (i, 0)),
        ],
        out_shape=[
            jax.ShapeDtypeStruct((M, nq), MATMUL_DTYPE),
            jax.ShapeDtypeStruct((M, nk), MATMUL_DTYPE),
            jax.ShapeDtypeStruct((M, nv), MATMUL_DTYPE),
        ],
        compiler_params=pltpu.CompilerParams(
            dimension_semantics=("parallel",),
            vmem_limit_bytes=_vmem_limit(pipelined)),
    )(x, w_cat, b_cat)


def pallas_linear_residual(x, w, b, r):
    M, In = x.shape
    Out = w.shape[1]
    tm = _row_tile(M, _LINEAR_TILE)
    pipelined = (_nbytes((tm, In), x.dtype) + _nbytes((In, Out), w.dtype)
                 + _nbytes((1, Out), b.dtype) + 2 * _nbytes((tm, Out), r.dtype))
    return pl.pallas_call(
        _linear_residual_kernel,
        grid=(pl.cdiv(M, tm),),
        in_specs=[
            pl.BlockSpec((tm, In), lambda i: (i, 0)),
            pl.BlockSpec((In, Out), lambda i: (0, 0)),
            pl.BlockSpec((1, Out), lambda i: (0, 0)),
            pl.BlockSpec((tm, Out), lambda i: (i, 0)),
        ],
        out_specs=pl.BlockSpec((tm, Out), lambda i: (i, 0)),
        out_shape=jax.ShapeDtypeStruct((M, Out), r.dtype),
        # accumulate into the residual buffer: no separate HBM output alloc.
        input_output_aliases={3: 0},
        compiler_params=pltpu.CompilerParams(
            dimension_semantics=("parallel",),
            vmem_limit_bytes=_vmem_limit(pipelined)),
    )(x, w, b, r)


def pallas_mha_attention(q_p, k_p, v_p, sz_b, len_q, len_k, n_head, d_k, d_v,
                         *, return_attn):
    """q_p/k_p/v_p: flat (sz_b*len, n_head*d) bf16 projections. Head split/merge
    happens inside the kernel (no HBM transposes)."""
    n_qk = n_head * d_k
    n_v = n_head * d_v
    # metadata-only reshapes (row-major split): free
    q3 = q_p.reshape(sz_b, len_q, n_qk)
    k3 = k_p.reshape(sz_b, len_k, n_qk)
    v3 = v_p.reshape(sz_b, len_k, n_v)
    inv_temp = 1.0 / (float(d_k) ** 0.5)
    tq = _row_tile(len_q, _ATTN_TQ)

    if return_attn:
        # Full-Lk blocks: needed because the attention-probability matrix is
        # materialized. NOTE: probs kept f32 for parity with the PyTorch module
        # (switch to bf16 to halve the dominant HBM write when acceptable).
        kernel = functools.partial(_mha_attn_full_kernel, n_head=n_head,
                                   d_k=d_k, d_v=d_v, inv_temp=inv_temp)
        pipelined = (_nbytes((1, tq, n_qk), q3.dtype)
                     + _nbytes((1, len_k, n_qk), k3.dtype)
                     + _nbytes((1, len_k, n_v), v3.dtype)
                     + _nbytes((1, tq, n_v), q3.dtype)
                     + _nbytes((n_head, 1, tq, len_k), jnp.float32))
        out, attn = pl.pallas_call(
            kernel,
            grid=(sz_b, pl.cdiv(len_q, tq)),
            in_specs=[
                pl.BlockSpec((1, tq, n_qk), lambda b, qi: (b, qi, 0)),
                pl.BlockSpec((1, len_k, n_qk), lambda b, qi: (b, 0, 0)),
                pl.BlockSpec((1, len_k, n_v), lambda b, qi: (b, 0, 0)),
            ],
            out_specs=[
                pl.BlockSpec((1, tq, n_v), lambda b, qi: (b, qi, 0)),
                pl.BlockSpec((n_head, 1, tq, len_k), lambda b, qi: (0, b, qi, 0)),
            ],
            out_shape=[
                jax.ShapeDtypeStruct((sz_b, len_q, n_v), q_p.dtype),
                jax.ShapeDtypeStruct((n_head, sz_b, len_q, len_k), jnp.float32),
            ],
            compiler_params=pltpu.CompilerParams(
                dimension_semantics=("parallel", "parallel"),
                vmem_limit_bytes=_vmem_limit(pipelined)),
        )(q3, k3, v3)
        return out, attn.reshape(n_head * sz_b, len_q, len_k)

    # return_attn=False: online-softmax over an Lk grid axis; working set is
    # independent of sequence length (v7x 64 MiB VMEM safe).
    tk = _col_tile(len_k, 512)
    kernel = functools.partial(_mha_attn_flash_kernel, n_head=n_head,
                               d_k=d_k, d_v=d_v, inv_temp=inv_temp)
    pipelined = (_nbytes((1, tq, n_qk), q3.dtype)
                 + _nbytes((1, tk, n_qk), k3.dtype)
                 + _nbytes((1, tk, n_v), v3.dtype)
                 + _nbytes((1, tq, n_v), q3.dtype))
    resident = (2 * _nbytes((n_head, tq, 128), jnp.float32)   # m, l (lane-padded)
                + _nbytes((tq, max(n_v, 128)), jnp.float32))  # acc
    out = pl.pallas_call(
        kernel,
        grid=(sz_b, pl.cdiv(len_q, tq), len_k // tk),
        in_specs=[
            pl.BlockSpec((1, tq, n_qk), lambda b, qi, ki: (b, qi, 0)),
            pl.BlockSpec((1, tk, n_qk), lambda b, qi, ki: (b, ki, 0)),
            pl.BlockSpec((1, tk, n_v), lambda b, qi, ki: (b, ki, 0)),
        ],
        out_specs=pl.BlockSpec((1, tq, n_v), lambda b, qi, ki: (b, qi, 0)),
        out_shape=jax.ShapeDtypeStruct((sz_b, len_q, n_v), q_p.dtype),
        scratch_shapes=[
            pltpu.VMEM((n_head, tq, 1), jnp.float32),   # running row max
            pltpu.VMEM((n_head, tq, 1), jnp.float32),   # running denominator
            pltpu.VMEM((tq, n_v), jnp.float32),         # merged-head accumulator
        ],
        compiler_params=pltpu.CompilerParams(
            dimension_semantics=("parallel", "parallel", "arbitrary"),
            vmem_limit_bytes=_vmem_limit(pipelined, resident)),
    )(q3, k3, v3)
    return out, None


# -----------------------------------------------------------------------------
# MultiHeadAttention forward
# -----------------------------------------------------------------------------

def multi_head_attention_forward(pw, q, k, v, *, n_head, d_k, d_v, return_attn):
    sz_b, len_q, d_model = q.shape
    _, len_k, _ = k.shape
    _, len_v, _ = v.shape

    residual = q

    if (q is k) and (k is v):
        # self-attention: single fused QKV projection (one pass over x)
        q_p, k_p, v_p = pallas_fused_qkv(
            q.reshape(sz_b * len_q, d_model),
            pw["w_qkv_w"], pw["w_qkv_b"],
            nq=n_head * d_k, nk=n_head * d_k)
    else:
        q_p = pallas_linear(q.reshape(sz_b * len_q, d_model),
                            pw["w_qs_w"], pw["w_qs_b"])
        k_p = pallas_linear(k.reshape(sz_b * len_k, d_model),
                            pw["w_ks_w"], pw["w_ks_b"])
        v_p = pallas_linear(v.reshape(sz_b * len_v, d_model),
                            pw["w_vs_w"], pw["w_vs_b"])

    out, attn = pallas_mha_attention(q_p, k_p, v_p, sz_b, len_q, len_k,
                                     n_head, d_k, d_v, return_attn=return_attn)

    # output projection + residual (dropout = identity at inference)
    out = pallas_linear_residual(
        out.reshape(sz_b * len_q, n_head * d_v),
        pw["fc_w"], pw["fc_b"],
        residual.reshape(sz_b * len_q, d_model),
    ).reshape(sz_b, len_q, d_model)

    return out, attn


@functools.partial(jax.jit, static_argnames=("n_head", "d_k", "d_v",
                                             "return_attn"))
def mha_self_attention(pw, x, *, n_head, d_k, d_v, return_attn=True):
    # q is k is v inside the trace -> fused-QKV path
    return multi_head_attention_forward(pw, x, x, x, n_head=n_head,
                                        d_k=d_k, d_v=d_v,
                                        return_attn=return_attn)


@functools.partial(jax.jit, static_argnames=("n_head", "d_k", "d_v",
                                             "return_attn"))
def mha_forward(pw, q, k, v, *, n_head, d_k, d_v, return_attn=True):
    return multi_head_attention_forward(pw, q, k, v, n_head=n_head,
                                        d_k=d_k, d_v=d_v,
                                        return_attn=return_attn)


# -----------------------------------------------------------------------------
# Parameter init, kernel-ready weight prep, and pure-JAX reference
# -----------------------------------------------------------------------------

def init_params(key, n_head, d_model, d_k, d_v):
    ks = jax.random.split(key, 8)
    std_qk = (2.0 / (d_model + d_k)) ** 0.5
    std_v = (2.0 / (d_model + d_v)) ** 0.5
    # Weights stored already transposed to (in, out) so kernels do x @ w.
    w_qs_w = std_qk * jax.random.normal(ks[0], (d_model, n_head * d_k), jnp.float32)
    w_ks_w = std_qk * jax.random.normal(ks[1], (d_model, n_head * d_k), jnp.float32)
    w_vs_w = std_v * jax.random.normal(ks[2], (d_model, n_head * d_v), jnp.float32)
    std_fc = (2.0 / (d_model + n_head * d_v)) ** 0.5
    fc_w = std_fc * jax.random.normal(ks[3], (n_head * d_v, d_model), jnp.float32)
    bqk = 1.0 / (d_model ** 0.5)
    bfc = 1.0 / ((n_head * d_v) ** 0.5)
    w_qs_b = jax.random.uniform(ks[4], (n_head * d_k,), jnp.float32, -bqk, bqk)
    w_ks_b = jax.random.uniform(ks[5], (n_head * d_k,), jnp.float32, -bqk, bqk)
    w_vs_b = jax.random.uniform(ks[6], (n_head * d_v,), jnp.float32, -bqk, bqk)
    fc_b = jax.random.uniform(ks[7], (d_model,), jnp.float32, -bfc, bfc)
    return {
        "w_qs_w": w_qs_w, "w_qs_b": w_qs_b,
        "w_ks_w": w_ks_w, "w_ks_b": w_ks_b,
        "w_vs_w": w_vs_w, "w_vs_b": w_vs_b,
        "fc_w": fc_w, "fc_b": fc_b,
    }


def prepare_weights(weights):
    """Kernel-ready params: bf16 weights, lane-dense (1, Out) f32 biases,
    fused-QKV operands pre-concatenated once (NOT per forward call)."""
    pw = {
        "w_qs_w": weights["w_qs_w"].astype(MATMUL_DTYPE),
        "w_ks_w": weights["w_ks_w"].astype(MATMUL_DTYPE),
        "w_vs_w": weights["w_vs_w"].astype(MATMUL_DTYPE),
        "fc_w": weights["fc_w"].astype(MATMUL_DTYPE),
        "w_qs_b": weights["w_qs_b"].reshape(1, -1).astype(jnp.float32),
        "w_ks_b": weights["w_ks_b"].reshape(1, -1).astype(jnp.float32),
        "w_vs_b": weights["w_vs_b"].reshape(1, -1).astype(jnp.float32),
        "fc_b": weights["fc_b"].reshape(1, -1).astype(jnp.float32),
    }
    pw["w_qkv_w"] = jnp.concatenate(
        [pw["w_qs_w"], pw["w_ks_w"], pw["w_vs_w"]], axis=1)
    pw["w_qkv_b"] = jnp.concatenate(
        [pw["w_qs_b"], pw["w_ks_b"], pw["w_vs_b"]], axis=1)
    return pw


def reference_forward(weights, q, k, v, *, n_head, d_k, d_v):
    sz_b, len_q, d_model = q.shape
    _, len_k, _ = k.shape
    residual = q
    qp = q @ weights["w_qs_w"] + weights["w_qs_b"]
    kp = k @ weights["w_ks_w"] + weights["w_ks_b"]
    vp = v @ weights["w_vs_w"] + weights["w_vs_b"]
    qh = qp.reshape(sz_b, len_q, n_head, d_k).transpose(2, 0, 1, 3) \
           .reshape(n_head * sz_b, len_q, d_k)
    kh = kp.reshape(sz_b, len_k, n_head, d_k).transpose(2, 0, 1, 3) \
           .reshape(n_head * sz_b, len_k, d_k)
    vh = vp.reshape(sz_b, len_k, n_head, d_v).transpose(2, 0, 1, 3) \
           .reshape(n_head * sz_b, len_k, d_v)
    scores = jnp.einsum("nqd,nkd->nqk", qh, kh) / (float(d_k) ** 0.5)
    attn = jax.nn.softmax(scores, axis=-1)
    out = jnp.einsum("nqk,nkd->nqd", attn, vh)
    out = out.reshape(n_head, sz_b, len_q, d_v).transpose(1, 2, 0, 3) \
             .reshape(sz_b, len_q, n_head * d_v)
    out = out @ weights["fc_w"] + weights["fc_b"] + residual
    return out, attn


if __name__ == "__main__":
    n_head, d_model, d_k, d_v = 2, 32, 16, 16
    sz_b, seq = 2, 8

    key = jax.random.PRNGKey(0)
    pk, xk = jax.random.split(key)
    weights = init_params(pk, n_head, d_model, d_k, d_v)
    pw = prepare_weights(weights)

    kx, kk, kv = jax.random.split(xk, 3)
    x = jax.random.normal(kx, (sz_b, seq, d_model), jnp.float32)
    k_in = jax.random.normal(kk, (sz_b, seq, d_model), jnp.float32)
    v_in = jax.random.normal(kv, (sz_b, seq, d_model), jnp.float32)

    # --- self-attention: fused-QKV projection + full-softmax kernel (attn returned)
    out_s, attn_s = mha_self_attention(pw, x, n_head=n_head, d_k=d_k, d_v=d_v,
                                       return_attn=True)
    out_s = jax.block_until_ready(out_s)
    attn_s = jax.block_until_ready(attn_s)
    assert out_s.shape == (sz_b, seq, d_model)
    assert attn_s.shape == (n_head * sz_b, seq, seq)
    ref_out, ref_attn = reference_forward(weights, x, x, x,
                                          n_head=n_head, d_k=d_k, d_v=d_v)
    assert jnp.allclose(out_s.astype(jnp.float32), ref_out, atol=5e-2, rtol=5e-2)
    assert jnp.allclose(attn_s, ref_attn, atol=5e-2, rtol=5e-2)

    # --- cross-attention: separate projections + flash/online-softmax kernel
    out_c, attn_c = mha_forward(pw, x, k_in, v_in, n_head=n_head, d_k=d_k,
                                d_v=d_v, return_attn=False)
    out_c = jax.block_until_ready(out_c)
    assert attn_c is None
    assert out_c.shape == (sz_b, seq, d_model)
    ref_out_c, _ = reference_forward(weights, x, k_in, v_in,
                                     n_head=n_head, d_k=d_k, d_v=d_v)
    assert jnp.allclose(out_c.astype(jnp.float32), ref_out_c,
                        atol=5e-2, rtol=5e-2)

    print("KERNEL_OK")
</pallas_src>

<mosaic_0001>
module attributes {stable_mosaic.version = 11 : i64} {
  func.func @_mha_attn_full_kernel(%arg0: i32, %arg1: i32, %arg2: memref<1x8x32xbf16, #tpu.memory_space<vmem>>, %arg3: memref<1x8x32xbf16, #tpu.memory_space<vmem>>, %arg4: memref<1x8x32xbf16, #tpu.memory_space<vmem>>, %arg5: memref<1x8x32xbf16, #tpu.memory_space<vmem>>, %arg6: memref<2x1x8x8xf32, #tpu.memory_space<vmem>>) attributes {dimension_semantics = [#tpu.dimension_semantics<parallel>, #tpu.dimension_semantics<parallel>], iteration_bounds = array<i64: 2, 1>, scalar_prefetch = 0 : i64, scratch_operands = 0 : i64, tpu.core_type = #tpu.core_type<tc>, window_params = [{transform_indices = @transform_0, window_bounds = array<i64: 1, 8, 32>}, {transform_indices = @transform_1, window_bounds = array<i64: 1, 8, 32>}, {transform_indices = @transform_2, window_bounds = array<i64: 1, 8, 32>}, {transform_indices = @transform_3, window_bounds = array<i64: 1, 8, 32>}, {transform_indices = @transform_4, window_bounds = array<i64: 2, 1, 8, 8>}]} {
    %c0 = arith.constant 0 : index
    %c0_0 = arith.constant 0 : index
    %c0_1 = arith.constant 0 : index
    %0 = vector.load %arg2[%c0, %c0_0, %c0_1] : memref<1x8x32xbf16, #tpu.memory_space<vmem>>, vector<1x8x32xbf16>
    %1 = vector.shape_cast %0 : vector<1x8x32xbf16> to vector<8x32xbf16>
    %c0_2 = arith.constant 0 : index
    %c0_3 = arith.constant 0 : index
    %c0_4 = arith.constant 0 : index
    %2 = vector.load %arg3[%c0_2, %c0_3, %c0_4] : memref<1x8x32xbf16, #tpu.memory_space<vmem>>, vector<1x8x32xbf16>
    %3 = vector.shape_cast %2 : vector<1x8x32xbf16> to vector<8x32xbf16>
    %c0_5 = arith.constant 0 : index
    %c0_6 = arith.constant 0 : index
    %c0_7 = arith.constant 0 : index
    %4 = vector.load %arg4[%c0_5, %c0_6, %c0_7] : memref<1x8x32xbf16, #tpu.memory_space<vmem>>, vector<1x8x32xbf16>
    %5 = vector.shape_cast %4 : vector<1x8x32xbf16> to vector<8x32xbf16>
    %6 = vector.extract_strided_slice %1 {offsets = [0, 0], sizes = [8, 16], strides = [1, 1]} : vector<8x32xbf16> to vector<8x16xbf16>
    %7 = arith.extf %6 : vector<8x16xbf16> to vector<8x16xf32>
    %cst = arith.constant 2.500000e-01 : f32
    %8 = vector.broadcast %cst : f32 to vector<8x16xf32>
    %9 = arith.mulf %7, %8 : vector<8x16xf32>
    %10 = arith.truncf %9 : vector<8x16xf32> to vector<8x16xbf16>
    %11 = vector.extract_strided_slice %3 {offsets = [0, 0], sizes = [8, 16], strides = [1, 1]} : vector<8x32xbf16> to vector<8x16xbf16>
    %12 = vector.extract_strided_slice %5 {offsets = [0, 0], sizes = [8, 16], strides = [1, 1]} : vector<8x32xbf16> to vector<8x16xbf16>
    %cst_8 = arith.constant dense<0.000000e+00> : vector<8x8xf32>
    %13 = tpu.matmul %10, %11, %cst_8 {dimension_numbers = #tpu.dot_dimension_numbers<[1], [1], [0], [0], [0, 0, 1, 0], [], []>} : vector<8x16xbf16>, vector<8x16xbf16>, vector<8x8xf32> -> vector<8x8xf32>
    %cst_9 = arith.constant dense<0xFF800000> : vector<8xf32>
    %14 = vector.multi_reduction <maximumf>, %13, %cst_9 [1] : vector<8x8xf32> to vector<8xf32>
    %15 = vector.shape_cast %14 : vector<8xf32> to vector<8x1xf32>
    %16 = vector.broadcast %15 : vector<8x1xf32> to vector<8x8xf32>
    %17 = arith.subf %13, %16 : vector<8x8xf32>
    %18 = math.exp %17 : vector<8x8xf32>
    %cst_10 = arith.constant dense<0.000000e+00> : vector<8xf32>
    %19 = vector.multi_reduction <add>, %18, %cst_10 [1] : vector<8x8xf32> to vector<8xf32>
    %20 = vector.shape_cast %19 : vector<8xf32> to vector<8x1xf32>
    %21 = tpu.reciprocal %20 {approx = true} : vector<8x1xf32> -> vector<8x1xf32>
    %22 = vector.broadcast %21 : vector<8x1xf32> to vector<8x8xf32>
    %23 = arith.mulf %18, %22 : vector<8x8xf32>
    %c0_11 = arith.constant 0 : index
    %c0_12 = arith.constant 0 : index
    %c0_13 = arith.constant 0 : index
    %c0_14 = arith.constant 0 : index
    %24 = vector.load %arg6[%c0_11, %c0_12, %c0_13, %c0_14] : memref<2x1x8x8xf32, #tpu.memory_space<vmem>>, vector<1x1x8x8xf32>
    %25 = vector.shape_cast %24 : vector<1x1x8x8xf32> to vector<8x8xf32>
    %26 = vector.shape_cast %23 : vector<8x8xf32> to vector<1x1x8x8xf32>
    tpu.vector_store %arg6[%c0_11, %c0_12, %c0_13, %c0_14], %26 {strides = array<i32>} : memref<2x1x8x8xf32, #tpu.memory_space<vmem>>, vector<1x1x8x8xf32>,
    %27 = arith.truncf %23 : vector<8x8xf32> to vector<8x8xbf16>
    %cst_15 = arith.constant dense<0.000000e+00> : vector<8x16xf32>
    %28 = tpu.matmul %27, %12, %cst_15 {dimension_numbers = #tpu.dot_dimension_numbers<[1], [0], [0], [1], [0, 0, 1, 1], [], []>} : vector<8x8xbf16>, vector<8x16xbf16>, vector<8x16xf32> -> vector<8x16xf32>
    %29 = arith.truncf %28 : vector<8x16xf32> to vector<8x16xbf16>
    %c0_16 = arith.constant 0 : index
    %c0_17 = arith.constant 0 : index
    %c0_18 = arith.constant 0 : index
    %30 = vector.load %arg5[%c0_16, %c0_17, %c0_18] : memref<1x8x32xbf16, #tpu.memory_space<vmem>>, vector<1x8x16xbf16>
    %31 = vector.shape_cast %30 : vector<1x8x16xbf16> to vector<8x16xbf16>
    %32 = vector.shape_cast %29 : vector<8x16xbf16> to vector<1x8x16xbf16>
    tpu.vector_store %arg5[%c0_16, %c0_17, %c0_18], %32 {strides = array<i32>} : memref<1x8x32xbf16, #tpu.memory_space<vmem>>, vector<1x8x16xbf16>,
    %33 = vector.extract_strided_slice %1 {offsets = [0, 16], sizes = [8, 16], strides = [1, 1]} : vector<8x32xbf16> to vector<8x16xbf16>
    %34 = arith.extf %33 : vector<8x16xbf16> to vector<8x16xf32>
    %cst_19 = arith.constant 2.500000e-01 : f32
    %35 = vector.broadcast %cst_19 : f32 to vector<8x16xf32>
    %36 = arith.mulf %34, %35 : vector<8x16xf32>
    %37 = arith.truncf %36 : vector<8x16xf32> to vector<8x16xbf16>
    %38 = vector.extract_strided_slice %3 {offsets = [0, 16], sizes = [8, 16], strides = [1, 1]} : vector<8x32xbf16> to vector<8x16xbf16>
    %39 = vector.extract_strided_slice %5 {offsets = [0, 16], sizes = [8, 16], strides = [1, 1]} : vector<8x32xbf16> to vector<8x16xbf16>
    %cst_20 = arith.constant dense<0.000000e+00> : vector<8x8xf32>
    %40 = tpu.matmul %37, %38, %cst_20 {dimension_numbers = #tpu.dot_dimension_numbers<[1], [1], [0], [0], [0, 0, 1, 0], [], []>} : vector<8x16xbf16>, vector<8x16xbf16>, vector<8x8xf32> -> vector<8x8xf32>
    %cst_21 = arith.constant dense<0xFF800000> : vector<8xf32>
    %41 = vector.multi_reduction <maximumf>, %40, %cst_21 [1] : vector<8x8xf32> to vector<8xf32>
    %42 = vector.shape_cast %41 : vector<8xf32> to vector<8x1xf32>
    %43 = vector.broadcast %42 : vector<8x1xf32> to vector<8x8xf32>
    %44 = arith.subf %40, %43 : vector<8x8xf32>
    %45 = math.exp %44 : vector<8x8xf32>
    %cst_22 = arith.constant dense<0.000000e+00> : vector<8xf32>
    %46 = vector.multi_reduction <add>, %45, %cst_22 [1] : vector<8x8xf32> to vector<8xf32>
    %47 = vector.shape_cast %46 : vector<8xf32> to vector<8x1xf32>
    %48 = tpu.reciprocal %47 {approx = true} : vector<8x1xf32> -> vector<8x1xf32>
    %49 = vector.broadcast %48 : vector<8x1xf32> to vector<8x8xf32>
    %50 = arith.mulf %45, %49 : vector<8x8xf32>
    %c1 = arith.constant 1 : index
    %c0_23 = arith.constant 0 : index
    %c0_24 = arith.constant 0 : index
    %c0_25 = arith.constant 0 : index
    %51 = vector.load %arg6[%c1, %c0_23, %c0_24, %c0_25] : memref<2x1x8x8xf32, #tpu.memory_space<vmem>>, vector<1x1x8x8xf32>
    %52 = vector.shape_cast %51 : vector<1x1x8x8xf32> to vector<8x8xf32>
    %53 = vector.shape_cast %50 : vector<8x8xf32> to vector<1x1x8x8xf32>
    tpu.vector_store %arg6[%c1, %c0_23, %c0_24, %c0_25], %53 {strides = array<i32>} : memref<2x1x8x8xf32, #tpu.memory_space<vmem>>, vector<1x1x8x8xf32>,
    %54 = arith.truncf %50 : vector<8x8xf32> to vector<8x8xbf16>
    %cst_26 = arith.constant dense<0.000000e+00> : vector<8x16xf32>
    %55 = tpu.matmul %54, %39, %cst_26 {dimension_numbers = #tpu.dot_dimension_numbers<[1], [0], [0], [1], [0, 0, 1, 1], [], []>} : vector<8x8xbf16>, vector<8x16xbf16>, vector<8x16xf32> -> vector<8x16xf32>
    %56 = arith.truncf %55 : vector<8x16xf32> to vector<8x16xbf16>
    %c0_27 = arith.constant 0 : index
    %c0_28 = arith.constant 0 : index
    %c16 = arith.constant 16 : index
    %57 = vector.load %arg5[%c0_27, %c0_28, %c16] : memref<1x8x32xbf16, #tpu.memory_space<vmem>>, vector<1x8x16xbf16>
    %58 = vector.shape_cast %57 : vector<1x8x16xbf16> to vector<8x16xbf16>
    %59 = vector.shape_cast %56 : vector<8x16xbf16> to vector<1x8x16xbf16>
    tpu.vector_store %arg5[%c0_27, %c0_28, %c16], %59 {strides = array<i32>} : memref<1x8x32xbf16, #tpu.memory_space<vmem>>, vector<1x8x16xbf16>,
    return
  }
  func.func @transform_0(%arg0: i32, %arg1: i32) -> (i32, i32, i32) {
    %c0_i32 = arith.constant 0 : i32
    %c0_i32_0 = arith.constant 0 : i32
    return %arg0, %arg1, %c0_i32 : i32, i32, i32
  }
  func.func @transform_1(%arg0: i32, %arg1: i32) -> (i32, i32, i32) {
    %c0_i32 = arith.constant 0 : i32
    %c0_i32_0 = arith.constant 0 : i32
    %c0_i32_1 = arith.constant 0 : i32
    return %arg0, %c0_i32, %c0_i32_0 : i32, i32, i32
  }
  func.func @transform_2(%arg0: i32, %arg1: i32) -> (i32, i32, i32) {
    %c0_i32 = arith.constant 0 : i32
    %c0_i32_0 = arith.constant 0 : i32
    %c0_i32_1 = arith.constant 0 : i32
    return %arg0, %c0_i32, %c0_i32_0 : i32, i32, i32
  }
  func.func @transform_3(%arg0: i32, %arg1: i32) -> (i32, i32, i32) {
    %c0_i32 = arith.constant 0 : i32
    %c0_i32_0 = arith.constant 0 : i32
    return %arg0, %arg1, %c0_i32 : i32, i32, i32
  }
  func.func @transform_4(%arg0: i32, %arg1: i32) -> (i32, i32, i32, i32) {
    %c0_i32 = arith.constant 0 : i32
    %c0_i32_0 = arith.constant 0 : i32
    %c0_i32_1 = arith.constant 0 : i32
    return %c0_i32, %arg0, %arg1, %c0_i32_0 : i32, i32, i32, i32
  }
}

module attributes {stable_mosaic.version = 11 : i64} {
  func.func @_linear_residual_kernel(%arg0: i32, %arg1: memref<16x32xbf16, #tpu.memory_space<vmem>>, %arg2: memref<32x32xbf16, #tpu.memory_space<vmem>>, %arg3: memref<1x32xf32, #tpu.memory_space<vmem>>, %arg4: memref<16x32xf32, #tpu.memory_space<vmem>>, %arg5: memref<16x32xf32, #tpu.memory_space<vmem>>) attributes {dimension_semantics = [#tpu.dimension_semantics<parallel>], iteration_bounds = array<i64: 1>, scalar_prefetch = 0 : i64, scratch_operands = 0 : i64, tpu.core_type = #tpu.core_type<tc>, window_params = [{transform_indices = @transform_0, window_bounds = array<i64: 16, 32>}, {pipeline_mode = #tpu.pipeline_mode<synchronous>, transform_indices = @transform_1, window_bounds = array<i64: 32, 32>}, {pipeline_mode = #tpu.pipeline_mode<synchronous>, transform_indices = @transform_2, window_bounds = array<i64: 1, 32>}, {transform_indices = @transform_3, window_bounds = array<i64: 16, 32>}, {transform_indices = @transform_4, window_bounds = array<i64: 16, 32>}]} {
    %c0 = arith.constant 0 : index
    %c0_0 = arith.constant 0 : index
    %0 = vector.load %arg1[%c0, %c0_0] : memref<16x32xbf16, #tpu.memory_space<vmem>>, vector<16x32xbf16>
    %c0_1 = arith.constant 0 : index
    %c0_2 = arith.constant 0 : index
    %1 = vector.load %arg2[%c0_1, %c0_2] : memref<32x32xbf16, #tpu.memory_space<vmem>>, vector<32x32xbf16>
    %cst = arith.constant dense<0.000000e+00> : vector<16x32xf32>
    %2 = tpu.matmul %0, %1, %cst {dimension_numbers = #tpu.dot_dimension_numbers<[1], [0], [0], [1], [0, 0, 1, 1], [], []>} : vector<16x32xbf16>, vector<32x32xbf16>, vector<16x32xf32> -> vector<16x32xf32>
    %c0_3 = arith.constant 0 : index
    %c0_4 = arith.constant 0 : index
    %3 = vector.load %arg3[%c0_3, %c0_4] : memref<1x32xf32, #tpu.memory_space<vmem>>, vector<1x32xf32>
    %4 = vector.broadcast %3 : vector<1x32xf32> to vector<16x32xf32>
    %5 = arith.addf %2, %4 : vector<16x32xf32>
    %c0_5 = arith.constant 0 : index
    %c0_6 = arith.constant 0 : index
    %6 = vector.load %arg4[%c0_5, %c0_6] : memref<16x32xf32, #tpu.memory_space<vmem>>, vector<16x32xf32>
    %7 = arith.addf %5, %6 : vector<16x32xf32>
    %c0_7 = arith.constant 0 : index
    %c0_8 = arith.constant 0 : index
    %8 = vector.load %arg5[%c0_7, %c0_8] : memref<16x32xf32, #tpu.memory_space<vmem>>, vector<16x32xf32>
    tpu.vector_store %arg5[%c0_7, %c0_8], %7 {strides = array<i32>} : memref<16x32xf32, #tpu.memory_space<vmem>>, vector<16x32xf32>,
    return
  }
  func.func @transform_0(%arg0: i32) -> (i32, i32) {
    %c0_i32 = arith.constant 0 : i32
    %c0_i32_0 = arith.constant 0 : i32
    return %arg0, %c0_i32 : i32, i32
  }
  func.func @transform_1(%arg0: i32) -> (i32, i32) {
    %c0_i32 = arith.constant 0 : i32
    %c0_i32_0 = arith.constant 0 : i32
    %c0_i32_1 = arith.constant 0 : i32
    return %c0_i32, %c0_i32_0 : i32, i32
  }
  func.func @transform_2(%arg0: i32) -> (i32, i32) {
    %c0_i32 = arith.constant 0 : i32
    %c0_i32_0 = arith.constant 0 : i32
    %c0_i32_1 = arith.constant 0 : i32
    return %c0_i32, %c0_i32_0 : i32, i32
  }
  func.func @transform_3(%arg0: i32) -> (i32, i32) {
    %c0_i32 = arith.constant 0 : i32
    %c0_i32_0 = arith.constant 0 : i32
    return %arg0, %c0_i32 : i32, i32
  }
  func.func @transform_4(%arg0: i32) -> (i32, i32) {
    %c0_i32 = arith.constant 0 : i32
    %c0_i32_0 = arith.constant 0 : i32
    return %arg0, %c0_i32 : i32, i32
  }
}

module attributes {stable_mosaic.version = 11 : i64} {
  func.func @_fused_qkv_kernel(%arg0: i32, %arg1: memref<16x32xf32, #tpu.memory_space<vmem>>, %arg2: memref<32x96xbf16, #tpu.memory_space<vmem>>, %arg3: memref<1x96xf32, #tpu.memory_space<vmem>>, %arg4: memref<16x32xbf16, #tpu.memory_space<vmem>>, %arg5: memref<16x32xbf16, #tpu.memory_space<vmem>>, %arg6: memref<16x32xbf16, #tpu.memory_space<vmem>>) attributes {dimension_semantics = [#tpu.dimension_semantics<parallel>], iteration_bounds = array<i64: 1>, scalar_prefetch = 0 : i64, scratch_operands = 0 : i64, tpu.core_type = #tpu.core_type<tc>, window_params = [{transform_indices = @transform_0, window_bounds = array<i64: 16, 32>}, {pipeline_mode = #tpu.pipeline_mode<synchronous>, transform_indices = @transform_1, window_bounds = array<i64: 32, 96>}, {pipeline_mode = #tpu.pipeline_mode<synchronous>, transform_indices = @transform_2, window_bounds = array<i64: 1, 96>}, {transform_indices = @transform_3, window_bounds = array<i64: 16, 32>}, {transform_indices = @transform_4, window_bounds = array<i64: 16, 32>}, {transform_indices = @transform_5, window_bounds = array<i64: 16, 32>}]} {
    %c0 = arith.constant 0 : index
    %c0_0 = arith.constant 0 : index
    %0 = vector.load %arg1[%c0, %c0_0] : memref<16x32xf32, #tpu.memory_space<vmem>>, vector<16x32xf32>
    %1 = arith.truncf %0 : vector<16x32xf32> to vector<16x32xbf16>
    %c0_1 = arith.constant 0 : index
    %c0_2 = arith.constant 0 : index
    %2 = vector.load %arg2[%c0_1, %c0_2] : memref<32x96xbf16, #tpu.memory_space<vmem>>, vector<32x96xbf16>
    %cst = arith.constant dense<0.000000e+00> : vector<16x96xf32>
    %3 = tpu.matmul %1, %2, %cst {dimension_numbers = #tpu.dot_dimension_numbers<[1], [0], [0], [1], [0, 0, 1, 1], [], []>} : vector<16x32xbf16>, vector<32x96xbf16>, vector<16x96xf32> -> vector<16x96xf32>
    %c0_3 = arith.constant 0 : index
    %c0_4 = arith.constant 0 : index
    %4 = vector.load %arg3[%c0_3, %c0_4] : memref<1x96xf32, #tpu.memory_space<vmem>>, vector<1x96xf32>
    %5 = vector.broadcast %4 : vector<1x96xf32> to vector<16x96xf32>
    %6 = arith.addf %3, %5 : vector<16x96xf32>
    %7 = vector.extract_strided_slice %6 {offsets = [0, 0], sizes = [16, 32], strides = [1, 1]} : vector<16x96xf32> to vector<16x32xf32>
    %8 = arith.truncf %7 : vector<16x32xf32> to vector<16x32xbf16>
    %c0_5 = arith.constant 0 : index
    %c0_6 = arith.constant 0 : index
    %9 = vector.load %arg4[%c0_5, %c0_6] : memref<16x32xbf16, #tpu.memory_space<vmem>>, vector<16x32xbf16>
    tpu.vector_store %arg4[%c0_5, %c0_6], %8 {strides = array<i32>} : memref<16x32xbf16, #tpu.memory_space<vmem>>, vector<16x32xbf16>,
    %10 = vector.extract_strided_slice %6 {offsets = [0, 32], sizes = [16, 32], strides = [1, 1]} : vector<16x96xf32> to vector<16x32xf32>
    %11 = arith.truncf %10 : vector<16x32xf32> to vector<16x32xbf16>
    %c0_7 = arith.constant 0 : index
    %c0_8 = arith.constant 0 : index
    %12 = vector.load %arg5[%c0_7, %c0_8] : memref<16x32xbf16, #tpu.memory_space<vmem>>, vector<16x32xbf16>
    tpu.vector_store %arg5[%c0_7, %c0_8], %11 {strides = array<i32>} : memref<16x32xbf16, #tpu.memory_space<vmem>>, vector<16x32xbf16>,
    %13 = vector.extract_strided_slice %6 {offsets = [0, 64], sizes = [16, 32], strides = [1, 1]} : vector<16x96xf32> to vector<16x32xf32>
    %14 = arith.truncf %13 : vector<16x32xf32> to vector<16x32xbf16>
    %c0_9 = arith.constant 0 : index
    %c0_10 = arith.constant 0 : index
    %15 = vector.load %arg6[%c0_9, %c0_10] : memref<16x32xbf16, #tpu.memory_space<vmem>>, vector<16x32xbf16>
    tpu.vector_store %arg6[%c0_9, %c0_10], %14 {strides = array<i32>} : memref<16x32xbf16, #tpu.memory_space<vmem>>, vector<16x32xbf16>,
    return
  }
  func.func @transform_0(%arg0: i32) -> (i32, i32) {
    %c0_i32 = arith.constant 0 : i32
    %c0_i32_0 = arith.constant 0 : i32
    return %arg0, %c0_i32 : i32, i32
  }
  func.func @transform_1(%arg0: i32) -> (i32, i32) {
    %c0_i32 = arith.constant 0 : i32
    %c0_i32_0 = arith.constant 0 : i32
    %c0_i32_1 = arith.constant 0 : i32
    return %c0_i32, %c0_i32_0 : i32, i32
  }
  func.func @transform_2(%arg0: i32) -> (i32, i32) {
    %c0_i32 = arith.constant 0 : i32
    %c0_i32_0 = arith.constant 0 : i32
    %c0_i32_1 = arith.constant 0 : i32
    return %c0_i32, %c0_i32_0 : i32, i32
  }
  func.func @transform_3(%arg0: i32) -> (i32, i32) {
    %c0_i32 = arith.constant 0 : i32
    %c0_i32_0 = arith.constant 0 : i32
    return %arg0, %c0_i32 : i32, i32
  }
  func.func @transform_4(%arg0: i32) -> (i32, i32) {
    %c0_i32 = arith.constant 0 : i32
    %c0_i32_0 = arith.constant 0 : i32
    return %arg0, %c0_i32 : i32, i32
  }
  func.func @transform_5(%arg0: i32) -> (i32, i32) {
    %c0_i32 = arith.constant 0 : i32
    %c0_i32_0 = arith.constant 0 : i32
    return %arg0, %c0_i32 : i32, i32
  }
}

</mosaic_0001>

<bundles_post_ra>
// kernel: mha_self_attention.4
= control target key start
LH: loop header
LB: loop body
LE: loop exit
PB: predicated region body
PF: predicated region fallthrough
CT: control target
= control target key end

     0   :  { %10 = vsyncpa [#allocation3], 0  ;;  %s1074_s0 = inlined_call_operand.vmem [shape: bf16[2,8,32], index: 0, kind: input, shape index: {}]   ;;  %s1075_s1 = inlined_call_operand.vmem [shape: bf16[2,8,32], index: 1, kind: input, shape index: {}]   ;;  %s1076_s2 = inlined_call_operand.vmem [shape: bf16[2,8,32], index: 2, kind: input, shape index: {}]   ;;  %s1077_s3 = inlined_call_operand.vmem [shape: bf16[2,8,32], index: 3, kind: output, shape index: {0}]   ;;  %s1078_s4 = inlined_call_operand.hbm [shape: f32[2,2,8,8], index: 4, kind: output, shape index: {1}]  }
   0x1   :  { %12 = vsyncpa [#allocation3 + $0x1], 0  ;;  %s910_s15 = smov 0   ;;  %s912_s16 = smov 0  }
   0x2   :  { %s914_s17 = smov 0   ;;  %s916_s18 = smov 0  }
   0x3   :  { %s918_s19 = smov 0   ;;  %s920_s20 = smov 0  }
   0x4 LB: > { %s670_s21 = sadd.s32 4294967295, %s875_s20   ;;  %s671_s22 = sadd.s32 4294967294, %s875_s20   ;;  %s875_s20 = sphi %s920_s20, %s18_s20   ;;  %s871_s19 = sphi %s918_s19, %s1085_s19   ;;  %s867_s18 = sphi %s916_s18, %s1084_s18   ;;  %s863_s17 = sphi %s914_s17, %s1083_s17   ;;  %s859_s16 = sphi %s912_s16, %s1082_s16   ;;  %s855_s15 = sphi %s910_s15, %s1081_s15  }
   0x5   : > { %s30_s23 = sadd.s32 1, %s871_s19  ;;  %s147_s24 = sadd.s32 1, %s863_s17 }
   0x6   : > { %p32_p0 = scmp.ge.s32.totalorder %s30_s23, 2  ;;  %p157_p1 = scmp.ne.s32.totalorder %s863_s17, %s859_s16 }
   0x7   : > { %p158_p2 = scmp.eq.s32.totalorder %s670_s21, 1  ;;  %p163_p3 = scmp.ne.s32.totalorder %s859_s16, %s855_s15 }
   0x8   : > { %s1087_s23 = smov (%p32_p0, %s30_s23), 0  ;;  %p164_p5 = scmp.eq.s32.totalorder %s671_s22, 1 }
   0x9   : > { %p950_p4 = por %p158_p2, %p157_p1  ;;  %s142_s26 = ssub.s32 %s871_s19, %s1087_s23 }
   0xa   : > { %p674_p6 = scmp.ge.s32.totalorder %s875_s20, 1  ;;  %p145_p7 = scmp.eq.s32.totalorder %s142_s26, 0 }
   0xb   : > { %p957_p8 = por %p164_p5, %p163_p3  ;;  %p206_p9 = scmp.lt.s32.totalorder %s875_s20, 3 }
   0xc   : > { %s963_s28 = scalar_select %p145_p7, %s863_s17, %s147_s24  }
   0xd   : > { %p207_p10 = pnand %p674_p6, %p206_p9 }
   0xe   : > { %p249_p11 = scmp.lt.s32.totalorder (!%p207_p10), %s867_s18, 1  ;;  %v877_v0 = vmov (!%p207_p10), 0.0   ;;  %vm878_vm0 = vmmov (!%p207_p10), 0   ;;  %vm278_vm1 = vcmask (!%p207_p10), 130048   ;;  %vm325_vm2 = vcmask (!%p207_p10), 64512   ;;  %s879_s11 = smov (!%p207_p10), 112  }
   0xf   : > { %210 = sbr.rel (%p207_p10) target bundleno = 1429 (0x595), region = 32  ;;  %701 = vmatprep.subr.bf16.mxu0 (!%p207_p10), %v877_v0  ;;  %703 = vmatprep.mubr.msk.bf16.mxu0 (!%p207_p10), %vm878_vm0, %v877_v0  ;;  %vm342_vm3 = vcmask (!%p207_p10), 1043456   ;;  %s246_s21 = sand.u32 (!%p207_p10), 1, %s859_s16   ;;  %vm387_vm4 = vcmask (!%p207_p10), 125952  }
  0x10   : > { %707 = vmatprep.subr.bf16.mxu1 (!%p207_p10), %v877_v0  ;;  %709 = vmatprep.mubr.msk.bf16.mxu1 (!%p207_p10), %vm878_vm0, %v877_v0  ;;  %s675_s22 = sshll.u32 (!%p207_p10), %s246_s21, 4 }
  0x11   : > { %s995_s24 = scalar_lea.vmem (!%p207_p10), [#allocation2], %s675_s22 }
  0x12   : > { %s541_s6 = sshll.u32 (!%p207_p10), %s995_s24, 4  ;;  %s1023_s6 = int_to_ptr.vmem [resolvable:$true] %s541_s6 }
  0x16   : > { %s250_s29 = scalar_select %p249_p11, %s867_s18, 1 }
  0x18   : > { %s969_s30 = sshll.u32 %s250_s29, 2 }
  0x19   : > { %s259_s7 = scalar_lea.vmem %s1075_s1, %s969_s30  ;;  %s255_s10 = scalar_lea.vmem %s1074_s0, %s969_s30 }
  0x1a   : > { %v273_v1 = vld [vmem:[%s259_s7] sm:$0xf]  ;;  %s263_s14 = scalar_lea.vmem %s1076_s2, %s969_s30  ;;  %s1006_s5 = scalar_lea.vmem %s1077_s3, %s969_s30 }
  0x1b   : > { %v272_v2 = vld [vmem:[%s255_s10] sm:$0xf]  ;;  %v283_v3 = vsel %vm278_vm1, %v273_v1, 0  ;;  %v682_v12 = vcombine.low %v273_v1, %v273_v1  ;;  %s689_s30 = sshll.u32 %s867_s18, 7  ;;  %s1027_s10 = scalar_lea.sflag [#allocation3], %s246_s21 }
  0x1c   : > { %v275_v4 = vunpack.c.l.bf16 %v272_v2  ;;  %702 = vmatpush3.bf16.xpose.msra.mxu0 %v283_v3  ;;  %v274_v18 = vld [vmem:[%s263_s14] sm:$0xf]  ;;  %s1021_s9 = scalar_lea.hbm %s1078_s4, %s689_s30  ;;  %s880_s18 = smov [#allocation2]  }
  0x1d   : > { %719 = vmatprep.subr.bf16.mxu0 %v877_v0  ;;  %395 = vrot.lane.b32.xlu1 %v682_v12, %s879_s11  ;;  %v344_v19 = vsel %vm342_vm3, %v274_v18, 0  ;;  %v685_v37 = vcombine.low %v274_v18, %v274_v18  ;;  %s801_s12 = sshll.u32 %s880_s18, 4  ;;  %s802_s12 = int_to_ptr.vmem [resolvable:$false] %s801_s12 }
  0x1e   : > { %v276_v5 = vmul.f32 0.25, %v275_v4  ;;  %708 = vmatpush3.bf16.msra.mxu1 %v344_v19  ;;  %s803_s13 = scalar_lea.vmem %s802_s12, 512  ;;  %p804_p1 = scmp.lt.s32.totalorder %s1023_s6, %s802_s12 }
  0x1f   : > { %713 = vmatprep.subr.bf16.mxu1 %v877_v0 }
  0x20   : > { %v277_v6 = vpack.c.bf16 %v276_v5, %v276_v5 }
  0x22   : > { %390 = vrot.lane.b32.xlu1 %v277_v6, %s879_s11 }
  0x23   : > { %704 = vmatmul.mubr.msk.bf16.vlgmr.msra.gmra.mrb[0].mxu0 %vm278_vm1, %v277_v6 }
  0x24   : > { %721 = vmatprep.mubr.msk.bf16.mxu0 %vm878_vm0, %v877_v0 }
  0x8f   : > { %v396_v22 = vpop.permute.xlu1 %395 }
  0x90   : > { %v401_v24 = vsel %vm278_vm1, %v396_v22, 0 }
  0x94   : > { %v391_v26 = vpop.permute.xlu1 %390 }
  0xf6   : > { %v319_v7 = vpop.f32.mrb[0].mxu0 }
  0xf7   : > { %v705_v8 = vpop.f32.mrb[1].mxu0  ;;  %v326_v9 = vsel %vm325_vm2, %v319_v7, -inf }
  0xf8   : > { %327 = vmax.xlane.f32.xlu0 %v326_v9  ;;  %v322_v10 = vpop.f32.mrb[2].mxu0 }
  0xf9   : > { %v706_v11 = vpop.f32.mrb[3].mxu0 }
 0x185   : > { %v328_v13 = vpop.xlane.xlu0 %327 }
 0x186   : > { %v329_v14 = vsub.f32 %v319_v7, %v328_v13 }
 0x188   : > { %v330_v15 = vmul.f32 1.442695, %v329_v14 }
 0x18a   : > { %789 = vpow2.f32 %v330_v15 }
 0x194   : > { %v790_v16 = vpop.eup %789 }
 0x195   : > { %v332_v17 = vsel %vm325_vm2, %v790_v16, 0.0 }
 0x196   : > { %333 = vadd.xlane.f32.xlu0 %v332_v17 }
 0x223   : > { %v334_v20 = vpop.xlane.xlu0 %333 }
 0x224   : > { %791 = vrcp.f32 %v334_v20 }
 0x22e   : > { %v792_v21 = vpop.eup %791 }
 0x22f   : > { %v336_v23 = vmul.f32 %v792_v21, %v790_v16 }
 0x231   : > { %337 = vst.msk [vmem:[%s995_s24] sm:$0xff] %vm325_vm2, %v336_v23  ;;  %v338_v25 = vpack.c.bf16 %v336_v23, %v336_v23 }
 0x233   : > { %710 = vmatmul.mubr.msk.bf16.vlgmr.msra.gmra.mrb[0].mxu1 %vm325_vm2, %v338_v25 }
 0x234   : > { %714 = vmatpush3.bf16.xpose.msra.mxu1 %v401_v24  ;;  %715 = vmatprep.mubr.msk.bf16.mxu1 %vm878_vm0, %v877_v0 }
 0x23b   : > { %716 = vmatmul.mubr.msk.bf16.vlgmr.msra.gmra.mrb[4].mxu1 %vm278_vm1, %v391_v26 }
 0x306   : > { %v380_v27 = vpop.f32.mrb[0].mxu1 }
 0x307   : > { %v386_v28 = vpack.c.bf16 %v380_v27, %v380_v27  ;;  %v711_v29 = vpop.f32.mrb[1].mxu1 }
 0x308   : > { %v383_v30 = vpop.f32.mrb[2].mxu1 }
 0x309   : > { %388 = vst.msk [vmem:[%s1006_s5] sm:$0xf] %vm387_vm4, %v386_v28  ;;  %v712_v31 = vpop.f32.mrb[3].mxu1 }
 0x30e   : > { %v437_v32 = vpop.f32.mrb[4].mxu1 }
 0x30f   : > { %v717_v33 = vpop.f32.mrb[5].mxu1  ;;  %v443_v34 = vsel %vm325_vm2, %v437_v32, -inf }
 0x310   : > { %444 = vmax.xlane.f32.xlu0 %v443_v34  ;;  %v440_v35 = vpop.f32.mrb[6].mxu1 }
 0x311   : > { %v718_v36 = vpop.f32.mrb[7].mxu1 }
 0x326   : > { %460 = vrot.lane.b32.xlu0 %v685_v37, %s879_s11  ;;  %s797_s11 = scalar_lea.vmem %s1023_s6, 256 }
 0x327   : > { %p798_p12 = scmp.ne.s32.totalorder %s1023_s6, %s797_s11  ;;  %p805_p2 = scmp.lt.s32.totalorder %s803_s13, %s797_s11 }
 0x329   : > { %p799_p13 = pnand %p798_p12, %p950_p4  ;;  %p806_p3 = por %p805_p2, %p804_p1 }
 0x32b   : > { %p800_p0 = pneg %p799_p13 }
 0x32d   : > { %p807_p5 = pnand %p806_p3, %p800_p0 }
 0x39d   : > { %v445_v38 = vpop.xlane.xlu0 %444 }
 0x39e   : > { %v446_v39 = vsub.f32 %v437_v32, %v445_v38 }
 0x3a0   : > { %v447_v40 = vmul.f32 1.442695, %v446_v39 }
 0x3a1   : > { %v461_v43 = vpop.permute.xlu0 %460 }
 0x3a2   : > { %793 = vpow2.f32 %v447_v40  ;;  %v466_v44 = vsel %vm342_vm3, %v461_v43, 0 }
 0x3a3   : > { %720 = vmatpush3.bf16.msra.mxu0 %v466_v44 }
 0x3ac   : > { %v794_v41 = vpop.eup %793 }
 0x3ad   : > { %v449_v42 = vsel %vm325_vm2, %v794_v41, 0.0 }
 0x3ae   : > { %450 = vadd.xlane.f32.xlu1 %v449_v42 }
 0x43b   : > { %v451_v45 = vpop.xlane.xlu1 %450 }
 0x43c   : > { %795 = vrcp.f32 %v451_v45 }
 0x446   : > { %v796_v46 = vpop.eup %795 }
 0x447   : > { %v453_v47 = vmul.f32 %v796_v46, %v794_v41 }
 0x449   : > { %684 = vst.msk [vmem:[%s995_s24 + $0x8] sm:$0xff] %vm325_vm2, %v453_v47  ;;  %v456_v48 = vpack.c.bf16 %v453_v47, %v453_v47 }
 0x44b   : > { %722 = vmatmul.mubr.msk.bf16.vlgmr.msra.gmra.mrb[4].mxu0 %vm325_vm2, %v456_v48 }
 0x44c   : > { %810 = shalt.err (!%p807_p5)
}
 0x44d   : > { %s811_s14 = scalar_lea.hbm %s1021_s9, 256  ;;  %s815_s24 = scalar_lea.hbm %s1078_s4, 512 }
 0x44e   : > { %p812_p6 = scmp.ne.s32.totalorder %s1021_s9, %s811_s14  ;;  %p816_p10 = scmp.lt.u32.totalorder %s1021_s9, %s1078_s4 }
 0x44f   : > { %p817_p11 = scmp.lt.u32.totalorder %s815_s24, %s811_s14  ;;  %p819_p13 = scmp.lt.u32.totalorder %s811_s14, %s1021_s9 }
 0x450   : > { %p813_p7 = pnand %p812_p6, %p950_p4 }
 0x451   : > { %p818_p12 = por %p817_p11, %p816_p10 }
 0x452   : > { %p814_p9 = pneg %p813_p7 }
 0x453   : > { %p820_p0 = por %p819_p13, %p818_p12 }
 0x455   : > { %p821_p1 = pnand %p820_p0, %p814_p9 }
 0x457   : > { %824 = shalt.err (!%p821_p1)
}
 0x458   : > { %s881_s30 = smov 128   ;;  %s882_s7 = smov 256   ;;  %vm515_vm5 = vcmask 257152  }
 0x459   : > { %s883_s8 = smov 8   ;;  %s884_s11 = smov 16  }
 0x45a   : > { %725 = dma.vmem_to_hbm [thread:$0]  (%p950_p4), %s1023_s6, 256, %s1021_s9, %s1027_s10, %s881_s30, %s882_s7, %s883_s8  }
 0x51e   : > { %v502_v49 = vpop.f32.mrb[4].mxu0 }
 0x51f   : > { %v692_v50 = vpack.c.bf16 %v502_v49, %v502_v49  ;;  %v723_v51 = vpop.f32.mrb[5].mxu0 }
 0x520   : > { %v505_v52 = vpop.f32.mrb[6].mxu0 }
 0x521   : > { %512 = vrot.lane.b32.xlu0 %v692_v50, %s884_s11  ;;  %v724_v53 = vpop.f32.mrb[7].mxu0 }
 0x593   : > { %v513_v54 = vpop.permute.xlu0 %512 }
 0x594   : > { %516 = vst.msk [vmem:[%s1006_s5] sm:$0xf] %vm515_vm5, %v513_v54 }
 0x595 PF: > { %p731_p2 = scmp.ge.s32.totalorder %s875_s20, 2  ;;  %s566_s18 = sand.u32 1, %s855_s15  }
 0x596   : > { %s567_s25 = scalar_lea.sflag [#allocation3], %s566_s18 }
 0x597   : > { %p728_p3 = pnand %p731_p2, %p957_p8 }
 0x599   : > { %850 = dma.done.wait (!%p728_p3), %s567_s25, 256  }
 0x59a   : > { %852 = vsyncadd (!%p728_p3), %s567_s25, 4294967040  ;;  %s18_s20 = sadd.s32 1, %s875_s20   ;;  %s1081_s15 = smov %s859_s16 }
 0x59b   : > { %p15_p4 = scmp.ge.s32.totalorder %s18_s20, 4   ;;  %s1082_s16 = smov %s863_s17 }
 0x59c   : > { %s1083_s17 = smov %s963_s28  ;;  %s1084_s18 = smov %s871_s19 }
 0x59d   : > { %s1085_s19 = smov %s1087_s23  ;;  %17 = sbr.rel (!%p15_p4) target bundleno = 4 (0x4), region = 86 }
 0x5a4   :  { %572 = vsyncpa [#allocation3], 1 }
 0x5a5   :  { %574 = vsyncpa [#allocation3 + $0x1], 1 }

// kernel: mha_self_attention.5
= control target key start
LH: loop header
LB: loop body
LE: loop exit
PB: predicated region body
PF: predicated region fallthrough
CT: control target
= control target key end

     0   :  { %v124_v0 = vmov 0.0   ;;  %vm125_vm0 = vmmov 0   ;;  %vm48_vm1 = vcmask 261120   ;;  %s178_s1 = inlined_call_operand.vmem [shape: bf16[32,32], index: 1, kind: input, shape index: {}]   ;;  %s179_s0 = inlined_call_operand.vmem [shape: bf16[16,32], index: 0, kind: input, shape index: {}]   ;;  %s180_s2 = inlined_call_operand.vmem [shape: f32[1,32], index: 2, kind: input, shape index: {}]   ;;  %s181_s3 = inlined_call_operand.vmem [shape: f32[16,32], index: 3, kind: input, shape index: {}, may-alias: {3,4}]   ;;  %s182_s4 = inlined_call_operand.vmem [shape: f32[16,32], index: 4, kind: output, shape index: {}, may-alias: {3,4}]  }
   0x1   :  { %111 = vmatprep.subr.bf16.mxu0 %v124_v0  ;;  %v121_v1 = vld [vmem:[%s178_s1] sm:$0xff]   ;;  %115 = vmatprep.mubr.msk.bf16.mxu0 %vm125_vm0, %v124_v0  ;;  %v122_v2 = vld [vmem:[%s178_s1 + $0x8] sm:$0xff]  }
   0x2   :  { %112 = vmatpush3.bf16.msra.mxu0 %v121_v1  ;;  %v123_v3 = vld [vmem:[%s179_s0] sm:$0xff]   ;;  %v94_v10 = vld [vmem:[%s181_s3 + $0x8] sm:$0xff] }
   0x3   :  { %113 = vmatprep.subr.bf16.mxu0 %v124_v0  ;;  %v103_v4 = vld [vmem:[%s180_s2] ss:$0 sm:$0xff] }
   0x4   :  { %v93_v6 = vld [vmem:[%s181_s3] sm:$0xff] }
   0x6   :  { %114 = vmatpush3.bf16.msra.mxu0 %v122_v2 }
   0x9   :  { %116 = vmatmul.mubr.msk.bf16.vlgmr.msra.gmra.mrb[0].mxu0 %vm48_vm1, %v123_v3 }
  0xdc   :  { %v86_v5 = vpop.f32.mrb[0].mxu0 }
  0xdd   :  { %v87_v7 = vadd.f32 %v103_v4, %v86_v5  ;;  %v117_v8 = vpop.f32.mrb[1].mxu0 }
  0xde   :  { %v89_v9 = vpop.f32.mrb[2].mxu0 }
  0xdf   :  { %v95_v11 = vadd.f32 %v93_v6, %v87_v7  ;;  %v90_v12 = vadd.f32 %v103_v4, %v89_v9  ;;  %v118_v13 = vpop.f32.mrb[3].mxu0 }
  0xe1   :  { %97 = vst.msk [vmem:[%s182_s4] sm:$0xff] %vm48_vm1, %v95_v11  ;;  %v96_v14 = vadd.f32 %v94_v10, %v90_v12 }
  0xe3   :  { %98 = vst.msk [vmem:[%s182_s4 + $0x8] sm:$0xff] %vm48_vm1, %v96_v14 }

// kernel: mha_self_attention.3
= control target key start
LH: loop header
LB: loop body
LE: loop exit
PB: predicated region body
PF: predicated region fallthrough
CT: control target
= control target key end

     0   :  { %v153_v0 = vmov 0.0   ;;  %vm154_vm0 = vmmov 0   ;;  %vm44_vm1 = vcmask 261120   ;;  %vm97_vm2 = vcmask 257024   ;;  %s155_s28 = smov 64   ;;  %s156_s29 = smov 96   ;;  %s226_s1 = inlined_call_operand.vmem [shape: bf16[32,96], index: 1, kind: input, shape index: {}]   ;;  %s227_s0 = inlined_call_operand.vmem [shape: f32[16,32], index: 0, kind: input, shape index: {}]   ;;  %s228_s2 = inlined_call_operand.vmem [shape: f32[1,96], index: 2, kind: input, shape index: {}]   ;;  %s229_s3 = inlined_call_operand.vmem [shape: bf16[16,32], index: 3, kind: output, shape index: {0}]   ;;  %s230_s5 = inlined_call_operand.vmem [shape: bf16[16,32], index: 5, kind: output, shape index: {2}]   ;;  %s231_s4 = inlined_call_operand.vmem [shape: bf16[16,32], index: 4, kind: output, shape index: {1}]  }
   0x1   :  { %139 = vmatprep.subr.bf16.mxu0 %v153_v0  ;;  %v151_v1 = vld [vmem:[%s226_s1] sm:$0xff]   ;;  %143 = vmatprep.mubr.msk.bf16.mxu0 %vm154_vm0, %v153_v0  ;;  %v152_v2 = vld [vmem:[%s226_s1 + $0x8] sm:$0xff]  }
   0x2   :  { %140 = vmatpush3.bf16.msra.mxu0 %v151_v1  ;;  %v18_v3 = vld [vmem:[%s227_s0] sm:$0xff]  ;;  %v19_v4 = vld [vmem:[%s227_s0 + $0x8] sm:$0xff] }
   0x3   :  { %141 = vmatprep.subr.bf16.mxu0 %v153_v0  ;;  %v20_v5 = vpack.c.bf16 %v19_v4, %v18_v3  ;;  %v128_v6 = vld [vmem:[%s228_s2] ss:$0 sm:$0xff] }
   0x6   :  { %142 = vmatpush3.bf16.msra.mxu0 %v152_v2 }
   0x9   :  { %144 = vmatmul.mubr.msk.bf16.vlgmr.msra.gmra.mrb[0].mxu0 %vm44_vm1, %v20_v5 }
  0xdc   :  { %v82_v7 = vpop.f32.mrb[0].mxu0 }
  0xdd   :  { %v83_v8 = vadd.f32 %v128_v6, %v82_v7  ;;  %v145_v9 = vpop.f32.mrb[1].mxu0 }
  0xde   :  { %v85_v10 = vpop.f32.mrb[2].mxu0 }
  0xdf   :  { %v134_v11 = vpack.c.bf16 %v83_v8, %v83_v8  ;;  %v86_v12 = vadd.f32 %v128_v6, %v85_v10  ;;  %v146_v13 = vpop.f32.mrb[3].mxu0 }
  0xe1   :  { %98 = vst.msk [vmem:[%s229_s3] sm:$0xf] %vm97_vm2, %v134_v11  ;;  %v135_v14 = vpack.c.bf16 %v86_v12, %v86_v12  ;;  %108 = vrot.lane.b32.xlu1 %v134_v11, %s155_s28  ;;  %100 = vrot.lane.b32.xlu0 %v134_v11, %s156_s29 }
  0xe3   :  { %99 = vst.msk [vmem:[%s229_s3 + $0x4] sm:$0xf] %vm97_vm2, %v135_v14 }
  0xe5   :  { %110 = vrot.lane.b32.xlu1 %v135_v14, %s155_s28  ;;  %102 = vrot.lane.b32.xlu0 %v135_v14, %s156_s29 }
 0x153   :  { %v109_v15 = vpop.permute.xlu1 %108  ;;  %v101_v16 = vpop.permute.xlu0 %100 }
 0x154   :  { %114 = vst.msk [vmem:[%s230_s5] sm:$0xf] %vm97_vm2, %v109_v15  ;;  %106 = vst.msk [vmem:[%s231_s4] sm:$0xf] %vm97_vm2, %v101_v16 }
 0x157   :  { %v111_v17 = vpop.permute.xlu1 %110  ;;  %v103_v18 = vpop.permute.xlu0 %102 }
 0x158   :  { %115 = vst.msk [vmem:[%s230_s5 + $0x4] sm:$0xf] %vm97_vm2, %v111_v17  ;;  %107 = vst.msk [vmem:[%s231_s4 + $0x4] sm:$0xf] %vm97_vm2, %v103_v18 }

</bundles_post_ra>
